<compile_context>
chip_gen: v7x
topology: tpu7x:2x2x1
jax: 0.10.0
libtpu: 0.0.40
codegen_flags: <defaults>
</compile_context>

<pallas_src>
import functools

import jax
import jax.numpy as jnp
from jax.experimental import pallas as pl
from jax.experimental.pallas import tpu as pltpu

_LANE = 128


# ----------------------------------------------------------------------------
# Kernels
# ----------------------------------------------------------------------------
def _mesh_conv_first_kernel(w_ref, b_ref, x_ref, o_ref, *, cin):
    # w: (Cout, Cin)  b: (Cout, 1) f32  x: (3*Cin, tileN)  o: (Cout, tileN)
    w = w_ref[...]
    xa = x_ref[...]
    # Running max: at most two (Cout, tileN) f32 products live at once.
    y = jnp.dot(w, xa[:cin], preferred_element_type=jnp.float32)
    y = jnp.maximum(y, jnp.dot(w, xa[cin:2 * cin], preferred_element_type=jnp.float32))
    y = jnp.maximum(y, jnp.dot(w, xa[2 * cin:3 * cin], preferred_element_type=jnp.float32))
    o_ref[...] = (y + b_ref[...]).astype(o_ref.dtype)


def _mesh_conv_next_kernel(wg_ref, ws_ref, b_ref, xg_ref, xs_ref, o_ref, *, cin):
    # wg/ws: (Cout, Cin)  b: (Cout, 1) f32
    # xg: (3*Cin, tileN) gathered neighbors (channel-major)   xs: (Cin, tileN) self
    wg = wg_ref[...]
    xg = xg_ref[...]
    y = jnp.dot(wg, xg[:cin], preferred_element_type=jnp.float32)
    y = jnp.maximum(y, jnp.dot(wg, xg[cin:2 * cin], preferred_element_type=jnp.float32))
    y = jnp.maximum(y, jnp.dot(wg, xg[2 * cin:3 * cin], preferred_element_type=jnp.float32))
    y = y + jnp.dot(ws_ref[...], xs_ref[...], preferred_element_type=jnp.float32) + b_ref[...]
    o_ref[...] = y.astype(o_ref.dtype)


# ----------------------------------------------------------------------------
# Sizing helpers
# ----------------------------------------------------------------------------
def _round_up(x, m):
    return -(-x // m) * m


def _sublane_rows(rows, dtype):
    # Sublane padding: f32 tiles are (8,128), bf16 (16,128), int8 (32,128).
    it = max(jnp.dtype(dtype).itemsize, 1)
    pack = 8 * max(1, 4 // it)
    return _round_up(rows, pack)


def _vmem_budget_bytes():
    # Generation-aware VMEM budget: ~60% of physical capacity, capped at 96 MiB
    # (v7x: 64 MiB -> ~38 MiB; v5e/v6e: 128 MiB -> ~77 MiB). Conservative
    # fallback if the hardware query is unavailable.
    try:
        cap = getattr(pltpu.get_tpu_info(), "vmem_capacity_bytes", None)
    except Exception:  # pragma: no cover - non-TPU / old jax
        cap = None
    if not cap or cap <= 0:
        return 40 << 20
    return int(min(cap * 0.6, 96 << 20))


def _choose_tile_n(n_faces, stream_bytes_per_lane, vmem_bytes_per_lane, vmem_budget):
    # Largest tile the VMEM budget tolerates (double-buffered I/O + f32 intermediates).
    max_tile = max(_LANE, (vmem_budget // max(vmem_bytes_per_lane, 1)) // _LANE * _LANE)
    # Size each grid step by streamed bytes (~1.5 MiB) so the ~0.35us/step
    # overhead is amortized even at tiny channel counts.
    target_bytes = 3 << 19  # 1.5 MiB
    tile = _round_up(max(_LANE, target_bytes // max(stream_bytes_per_lane, 1)), _LANE)
    tile = min(tile, max_tile)
    if tile >= n_faces:
        # Whole problem in one full-extent block (legal even when N % 128 != 0).
        return n_faces
    steps = pl.cdiv(n_faces, tile)
    if steps % 2 == 1:
        # Prefer an even step count so v7x's two TensorCores split the
        # "parallel" axis evenly (no effect on single-TC v5e/v6e).
        tile_even = min(_round_up(pl.cdiv(n_faces, steps + 1), _LANE), max_tile)
        if tile_even >= _LANE and pl.cdiv(n_faces, tile_even) % 2 == 0:
            tile = tile_even
    return tile


# ----------------------------------------------------------------------------
# Wrapper
# ----------------------------------------------------------------------------
def single_mesh_conv(x, gfmm, w, b, *, is_first, compute_dtype=jnp.float32,
                     out_dtype=None, tile_n=None):
    """x: (1, C, N), gfmm: (3, N) int32, w: (Cout, Cin_eff), b: (Cout,) -> (1, Cout, N)."""
    n_faces = x.shape[-1]
    cout, cin_eff = w.shape
    out_dtype = x.dtype if out_dtype is None else out_dtype
    b2 = b.reshape(cout, 1).astype(jnp.float32)

    vmem_budget = _vmem_budget_bytes()
    it_c = jnp.dtype(compute_dtype).itemsize
    it_o = jnp.dtype(out_dtype).itemsize
    out_bpl = _sublane_rows(cout, out_dtype) * it_o
    # f32 intermediates: running max + one product (+ self term on the next path).
    acc_bpl = 3 * _sublane_rows(cout, jnp.float32) * 4

    if is_first:
        cin = cin_eff
        # (1, 3*Cin, N) -> (3*Cin, N): free squeeze; cast before any copy.
        x_all = x[0].astype(compute_dtype)
        in_bpl = _sublane_rows(3 * cin, compute_dtype) * it_c
        stream_bpl = in_bpl + out_bpl
        vmem_bpl = 2 * (in_bpl + out_bpl) + acc_bpl
        tn = tile_n if tile_n is not None else _choose_tile_n(
            n_faces, stream_bpl, vmem_bpl, vmem_budget)
        args = (w.astype(compute_dtype), b2, x_all)
        in_specs = [
            pl.BlockSpec((cout, cin), lambda i: (0, 0)),
            pl.BlockSpec((cout, 1), lambda i: (0, 0)),
            pl.BlockSpec((3 * cin, tn), lambda i: (0, i)),
        ]
        kernel = functools.partial(_mesh_conv_first_kernel, cin=cin)
        fixed_bytes = cout * cin * it_c + cout * 4
    else:
        cin = x.shape[1]
        assert cin_eff == 2 * cin, "weight must be (Cout, 2*Cin) when is_first=False"
        # Cast BEFORE gathering so the gather pass moves compute_dtype bytes.
        x0 = x[0].astype(compute_dtype)                          # (Cin, N)
        # Per-neighbor gathers, concatenated along channels: already the layout
        # the kernel consumes (no transpose / relayout pass over 3*Cin*N).
        x_g = jnp.concatenate(
            [x0[:, gfmm[0]], x0[:, gfmm[1]], x0[:, gfmm[2]]], axis=0)  # (3*Cin, N)
        in_bpl = (_sublane_rows(3 * cin, compute_dtype)
                  + _sublane_rows(cin, compute_dtype)) * it_c
        stream_bpl = in_bpl + out_bpl
        vmem_bpl = 2 * (in_bpl + out_bpl) + acc_bpl + _sublane_rows(cout, jnp.float32) * 4
        tn = tile_n if tile_n is not None else _choose_tile_n(
            n_faces, stream_bpl, vmem_bpl, vmem_budget)
        # Split the 1x1-conv weight: first Cin columns hit the gathered
        # neighbors, last Cin columns hit the (broadcast) self features.
        w_g = w[:, :cin].astype(compute_dtype)
        w_s = w[:, cin:].astype(compute_dtype)
        args = (w_g, w_s, b2, x_g, x0)
        in_specs = [
            pl.BlockSpec((cout, cin), lambda i: (0, 0)),
            pl.BlockSpec((cout, cin), lambda i: (0, 0)),
            pl.BlockSpec((cout, 1), lambda i: (0, 0)),
            pl.BlockSpec((3 * cin, tn), lambda i: (0, i)),
            pl.BlockSpec((cin, tn), lambda i: (0, i)),
        ]
        kernel = functools.partial(_mesh_conv_next_kernel, cin=cin)
        fixed_bytes = 2 * cout * cin * it_c + cout * 4

    grid = (pl.cdiv(n_faces, tn),)
    vmem_need = vmem_bpl * tn + fixed_bytes
    vmem_limit = int(max(16 << 20, min(vmem_need + (2 << 20), vmem_budget)))

    # No padding: the ragged last block's out-of-range lanes hold garbage in
    # the kernel, but the output store is masked to the true (cout, n_faces)
    # extent and nothing reduces across the face axis.
    out = pl.pallas_call(
        kernel,
        out_shape=jax.ShapeDtypeStruct((cout, n_faces), out_dtype),
        grid_spec=pltpu.PrefetchScalarGridSpec(
            num_scalar_prefetch=0,
            grid=grid,
            in_specs=in_specs,
            out_specs=pl.BlockSpec((cout, tn), lambda i: (0, i)),
        ),
        compiler_params=pltpu.CompilerParams(
            dimension_semantics=("parallel",),
            vmem_limit_bytes=vmem_limit,
        ),
    )(*args)

    return out[None]  # (1, Cout, N)


# ----------------------------------------------------------------------------
# Pure-JAX reference mirroring the PyTorch forward
# ----------------------------------------------------------------------------
def single_mesh_conv_ref(x, gfmm, w, b, *, is_first):
    n_faces = x.shape[-1]
    if is_first:
        cin = w.shape[1]
        xe = x.reshape(1, 3, cin, n_faces).transpose(0, 2, 1, 3)    # (1, Cin, 3, N)
    else:
        x_a = x[:, :, gfmm]                                         # (1, Cin, 3, N)
        x_b = jnp.broadcast_to(x[:, :, None, :], x_a.shape)
        xe = jnp.concatenate([x_a, x_b], axis=1)                    # (1, 2Cin, 3, N)
    xe = xe.reshape(1, -1, n_faces * 3)
    y = jnp.einsum("oc,bcl->bol", w, xe) + b[None, :, None]
    y = y.reshape(1, -1, 3, n_faces)
    return y.max(axis=2)


if __name__ == "__main__":
    key = jax.random.PRNGKey(0)
    k1, k2, k3, k4, k5 = jax.random.split(key, 5)

    in_channels = 4
    out_channels = 8

    # (256, None): aligned, single block.  (250, None): ragged, single
    # full-extent block.  (250, 128): forces a 2-step grid with a masked
    # ragged last block (exercises the no-padding path).
    for n_faces, tile_override in ((256, None), (250, None), (250, 128)):
        gfmm = jax.random.randint(k4, (3, n_faces), 0, n_faces, jnp.int32)

        # ---- is_first = True path -------------------------------------------
        w_first = jax.random.normal(k1, (out_channels, in_channels), jnp.float32) * 0.1
        b_first = jax.random.normal(k2, (out_channels,), jnp.float32) * 0.1
        x_first = jax.random.normal(k3, (1, 3 * in_channels, n_faces), jnp.float32)

        out_f = single_mesh_conv(x_first, gfmm, w_first, b_first,
                                 is_first=True, tile_n=tile_override)
        ref_f = single_mesh_conv_ref(x_first, gfmm, w_first, b_first, is_first=True)
        jax.block_until_ready(out_f)
        assert out_f.shape == (1, out_channels, n_faces)
        assert jnp.allclose(out_f, ref_f, atol=1e-5, rtol=1e-5)

        # ---- is_first = False path (split-weight formulation) ----------------
        w_next = jax.random.normal(k5, (out_channels, 2 * in_channels), jnp.float32) * 0.1
        b_next = jax.random.normal(k2, (out_channels,), jnp.float32) * 0.1
        x_next = jax.random.normal(k3, (1, in_channels, n_faces), jnp.float32)

        out_n = single_mesh_conv(x_next, gfmm, w_next, b_next,
                                 is_first=False, tile_n=tile_override)
        ref_n = single_mesh_conv_ref(x_next, gfmm, w_next, b_next, is_first=False)
        jax.block_until_ready(out_n)
        assert out_n.shape == (1, out_channels, n_faces)
        assert jnp.allclose(out_n, ref_n, atol=1e-5, rtol=1e-5)

        # ---- bf16 compute (+ bf16 output), mem-bound optimization; loose tol -
        out_bf = single_mesh_conv(x_next, gfmm, w_next, b_next, is_first=False,
                                  compute_dtype=jnp.bfloat16, out_dtype=jnp.bfloat16,
                                  tile_n=tile_override)
        jax.block_until_ready(out_bf)
        assert out_bf.dtype == jnp.bfloat16
        assert jnp.allclose(out_bf.astype(jnp.float32), ref_n, atol=5e-2, rtol=5e-2)

        out_bf_f = single_mesh_conv(x_first, gfmm, w_first, b_first, is_first=True,
                                    compute_dtype=jnp.bfloat16, tile_n=tile_override)
        jax.block_until_ready(out_bf_f)
        assert jnp.allclose(out_bf_f, ref_f, atol=5e-2, rtol=5e-2)

    print("KERNEL_OK")
</pallas_src>

<mosaic_0001>
module attributes {stable_mosaic.version = 11 : i64} {
  func.func @_mesh_conv_first_kernel(%arg0: i32, %arg1: memref<8x4xf32, #tpu.memory_space<vmem>>, %arg2: memref<8x1xf32, #tpu.memory_space<vmem>>, %arg3: memref<12x256xf32, #tpu.memory_space<vmem>>, %arg4: memref<8x256xf32, #tpu.memory_space<vmem>>) attributes {dimension_semantics = [#tpu.dimension_semantics<parallel>], iteration_bounds = array<i64: 1>, scalar_prefetch = 0 : i64, scratch_operands = 0 : i64, tpu.core_type = #tpu.core_type<tc>, window_params = [{pipeline_mode = #tpu.pipeline_mode<synchronous>, transform_indices = @transform_0, window_bounds = array<i64: 8, 4>}, {pipeline_mode = #tpu.pipeline_mode<synchronous>, transform_indices = @transform_1, window_bounds = array<i64: 8, 1>}, {transform_indices = @transform_2, window_bounds = array<i64: 12, 256>}, {transform_indices = @transform_3, window_bounds = array<i64: 8, 256>}]} {
    %c0 = arith.constant 0 : index
    %c0_0 = arith.constant 0 : index
    %0 = vector.load %arg1[%c0, %c0_0] : memref<8x4xf32, #tpu.memory_space<vmem>>, vector<8x4xf32>
    %c0_1 = arith.constant 0 : index
    %c0_2 = arith.constant 0 : index
    %1 = vector.load %arg3[%c0_1, %c0_2] : memref<12x256xf32, #tpu.memory_space<vmem>>, vector<12x256xf32>
    %2 = vector.extract_strided_slice %1 {offsets = [0, 0], sizes = [4, 256], strides = [1, 1]} : vector<12x256xf32> to vector<4x256xf32>
    %cst = arith.constant dense<0.000000e+00> : vector<8x256xf32>
    %3 = tpu.matmul %0, %2, %cst {dimension_numbers = #tpu.dot_dimension_numbers<[1], [0], [0], [1], [0, 0, 1, 1], [], []>} : vector<8x4xf32>, vector<4x256xf32>, vector<8x256xf32> -> vector<8x256xf32>
    %4 = vector.extract_strided_slice %1 {offsets = [4, 0], sizes = [4, 256], strides = [1, 1]} : vector<12x256xf32> to vector<4x256xf32>
    %cst_3 = arith.constant dense<0.000000e+00> : vector<8x256xf32>
    %5 = tpu.matmul %0, %4, %cst_3 {dimension_numbers = #tpu.dot_dimension_numbers<[1], [0], [0], [1], [0, 0, 1, 1], [], []>} : vector<8x4xf32>, vector<4x256xf32>, vector<8x256xf32> -> vector<8x256xf32>
    %6 = arith.maximumf %3, %5 : vector<8x256xf32>
    %7 = vector.extract_strided_slice %1 {offsets = [8, 0], sizes = [4, 256], strides = [1, 1]} : vector<12x256xf32> to vector<4x256xf32>
    %cst_4 = arith.constant dense<0.000000e+00> : vector<8x256xf32>
    %8 = tpu.matmul %0, %7, %cst_4 {dimension_numbers = #tpu.dot_dimension_numbers<[1], [0], [0], [1], [0, 0, 1, 1], [], []>} : vector<8x4xf32>, vector<4x256xf32>, vector<8x256xf32> -> vector<8x256xf32>
    %9 = arith.maximumf %6, %8 : vector<8x256xf32>
    %c0_5 = arith.constant 0 : index
    %c0_6 = arith.constant 0 : index
    %10 = vector.load %arg2[%c0_5, %c0_6] : memref<8x1xf32, #tpu.memory_space<vmem>>, vector<8x1xf32>
    %11 = vector.broadcast %10 : vector<8x1xf32> to vector<8x256xf32>
    %12 = arith.addf %9, %11 : vector<8x256xf32>
    %c0_7 = arith.constant 0 : index
    %c0_8 = arith.constant 0 : index
    %13 = vector.load %arg4[%c0_7, %c0_8] : memref<8x256xf32, #tpu.memory_space<vmem>>, vector<8x256xf32>
    tpu.vector_store %arg4[%c0_7, %c0_8], %12 {strides = array<i32>} : memref<8x256xf32, #tpu.memory_space<vmem>>, vector<8x256xf32>,
    return
  }
  func.func @transform_0(%arg0: i32) -> (i32, i32) {
    %c0_i32 = arith.constant 0 : i32
    %c0_i32_0 = arith.constant 0 : i32
    %c0_i32_1 = arith.constant 0 : i32
    return %c0_i32, %c0_i32_0 : i32, i32
  }
  func.func @transform_1(%arg0: i32) -> (i32, i32) {
    %c0_i32 = arith.constant 0 : i32
    %c0_i32_0 = arith.constant 0 : i32
    %c0_i32_1 = arith.constant 0 : i32
    return %c0_i32, %c0_i32_0 : i32, i32
  }
  func.func @transform_2(%arg0: i32) -> (i32, i32) {
    %c0_i32 = arith.constant 0 : i32
    %c0_i32_0 = arith.constant 0 : i32
    return %c0_i32, %arg0 : i32, i32
  }
  func.func @transform_3(%arg0: i32) -> (i32, i32) {
    %c0_i32 = arith.constant 0 : i32
    %c0_i32_0 = arith.constant 0 : i32
    return %c0_i32, %arg0 : i32, i32
  }
}

</mosaic_0001>

<bundles_post_ra>
// kernel: tpu_custom_call.1
= control target key start
LH: loop header
LB: loop body
LE: loop exit
PB: predicated region body
PF: predicated region fallthrough
CT: control target
= control target key end

     0   :  { %8 = vsyncpa [#allocation3], 0  ;;  %s428_s0 = inlined_call_operand.vmem [shape: f32[8,4], index: 0, kind: input, shape index: {}]   ;;  %s429_s1 = inlined_call_operand.vmem [shape: f32[8,1], index: 1, kind: input, shape index: {}]   ;;  %s430_s2 = inlined_call_operand.hbm [shape: f32[12,256], index: 2, kind: input, shape index: {}]   ;;  %s431_s3 = inlined_call_operand.hbm [shape: f32[8,256], index: 3, kind: output, shape index: {}]  }
   0x1   :  { %9 = vsyncpa [#allocation4], 0  ;;  %s363_s12 = smov [#allocation2]   ;;  %s315_s16 = scalar_lea.hbm %s430_s2, 512 }
   0x2   :  { %s19_s13 = sshll.u32 %s363_s12, 4  ;;  %p316_p0 = scmp.ne.s32.totalorder %s430_s2, %s315_s16  ;;  %s20_s13 = int_to_ptr.vmem [resolvable:$true] %s19_s13 }
   0x3   :  { %p319_p1 = scmp.lt.u32.totalorder %s315_s16, %s430_s2 }
   0x5   :  { %p321_p2 = pnand %p319_p1, %p316_p0 }
   0x7   :  { %324 = shalt.err (!%p321_p2)
}
   0x8   :  { %s325_s21 = scalar_lea.vmem %s20_s13, 512  ;;  %p330_p4 = scmp.lt.s32.totalorder %s20_s13, %s20_s13 }
   0x9   :  { %p326_p3 = scmp.ne.s32.totalorder %s20_s13, %s325_s21  ;;  %p331_p5 = scmp.lt.s32.totalorder %s325_s21, %s325_s21 }
   0xb   :  { %p332_p6 = por %p331_p5, %p330_p4 }
   0xd   :  { %p333_p7 = pnand %p332_p6, %p326_p3 }
   0xf   :  { %336 = shalt.err (!%p333_p7)
}
  0x10   :  { %s364_s22 = smov 256   ;;  %s365_s23 = smov 16  }
  0x11   :  { %25 = dma.hbm_to_vmem [thread:$0]  %s430_s2, 512, %s20_s13, [#allocation3], %s364_s22, %s364_s22, %s365_s23  }
  0x12   :  { %359 = dma.done.wait [#allocation3], 512  }
  0x13   :  { %360 = vsyncadd [#allocation3], 4294966784  ;;  %v366_v0 = vmov 0.0   ;;  %v367_v1 = vmov 0   ;;  %vm38_vm0 = vcmask 1043456   ;;  %v31_v2 = vld [vmem:[#allocation2 + $0x8] sm:$0xff] }
  0x14   :  { %109 = vmatprep.mubr.f32.mxu0 %v366_v0  ;;  %186 = vmatprep.mubr.f32.mxu1 %v366_v0  ;;  %v30_v3 = vld [vmem:[#allocation2] sm:$0xff]  ;;  %vm34_vm1 = vcmask 31744   ;;  %v117_v6 = vrot.slane %v31_v2, 4  ;;  %v33_v7 = vld [vmem:[#allocation2 + $0x18] sm:$0xf] }
  0x15   :  { %314 = vset.pattern.permute.xlu0 %v367_v1  ;;  %v29_v4 = vld [vmem:[%s428_s0] sm:$0xff]  ;;  %299 = vmatprep.subr.msk.mxu0 %vm38_vm0, %v31_v2  ;;  %v116_v5 = vrot.slane %v30_v3, 4  ;;  %v32_v8 = vld [vmem:[#allocation2 + $0x10] sm:$0xf]  ;;  %s368_s0 = smov [#allocation5]  }
  0x16   :  { %300 = vmatpush1.msk.msra.mxu0 %vm38_vm0, %v30_v3  ;;  %302 = vmatprep.subr.msk.mxu1 %vm38_vm0, %v117_v6  ;;  %v274_v9 = vld [vmem:[%s429_s1] sm:$0xff]  ;;  %s290_s1 = sshll.u32 %s368_s0, 4  ;;  %s291_s1 = int_to_ptr.vmem [resolvable:$true] %s290_s1 }
  0x17   :  { %301 = vmatmul.mubr.msk.f32.vlgmr.msra.gmra.mrb[0].mxu0 %vm34_vm1, %v29_v4  ;;  %305 = vmatprep.subr.msk.mxu0 %vm38_vm0, %v33_v7  ;;  %s337_s29 = scalar_lea.vmem %s291_s1, 256  ;;  %p342_p9 = scmp.lt.s32.totalorder %s291_s1, %s291_s1 }
  0x18   :  { %303 = vmatpush1.msk.msra.mxu1 %vm38_vm0, %v116_v5  ;;  %306 = vmatpush1.msk.msra.mxu0 %vm38_vm0, %v32_v8  ;;  %p338_p8 = scmp.ne.s32.totalorder %s291_s1, %s337_s29  ;;  %p343_p10 = scmp.lt.s32.totalorder %s337_s29, %s337_s29 }
  0x19   :  { %304 = vmatmul.mubr.msk.f32.vlgmr.msra.gmra.mrb[0].mxu1 %vm34_vm1, %v29_v4  ;;  %265 = vmatprep.mubr.f32.mxu0 %v366_v0 }
  0x1a   :  { %277 = vperm.xlu0 %314, %v274_v9   ;;  %p344_p11 = por %p343_p10, %p342_p9 }
  0x1b   :  { %307 = vmatmul.mubr.msk.f32.vlgmr.msra.gmra.mrb[2].mxu0 %vm34_vm1, %v29_v4 }
  0x1c   :  { %p345_p12 = pnand %p344_p11, %p338_p8 }
  0x99   :  { %v278_v17 = vpop.permute.xlu0 %277 }
  0xea   :  { %v111_v10 = vpop.f32.mrb[0].mxu0 }
  0xeb   :  { %v113_v11 = vpop.f32.mrb[1].mxu0 }
  0xec   :  { %v188_v12 = vpop.f32.mrb[0].mxu1 }
  0xed   :  { %v193_v13 = vmax.f32 %v111_v10, %v188_v12  ;;  %v190_v14 = vpop.f32.mrb[1].mxu1 }
  0xee   :  { %v194_v15 = vmax.f32 %v113_v11, %v190_v14  ;;  %v267_v16 = vpop.f32.mrb[2].mxu0 }
  0xef   :  { %v272_v18 = vmax.f32 %v193_v13, %v267_v16  ;;  %v269_v19 = vpop.f32.mrb[3].mxu0 }
  0xf0   :  { %v273_v20 = vmax.f32 %v194_v15, %v269_v19 }
  0xf1   :  { %v280_v21 = vadd.f32 %v278_v17, %v272_v18 }
  0xf2   :  { %v281_v22 = vadd.f32 %v278_v17, %v273_v20 }
  0xf3   :  { %282 = vst [vmem:[#allocation5] sm:$0xff] %v280_v21 }
  0xf4   :  { %283 = vst [vmem:[#allocation5 + $0x8] sm:$0xff] %v281_v22 }
  0xf5   :  { %348 = shalt.err (!%p345_p12)
}
  0xf6   :  { %s349_s5 = scalar_lea.hbm %s431_s3, 256 }
  0xf7   :  { %p350_p13 = scmp.ne.s32.totalorder %s431_s3, %s349_s5  ;;  %p353_p0 = scmp.lt.u32.totalorder %s349_s5, %s431_s3 }
  0xf9   :  { %p355_p1 = pnand %p353_p0, %p350_p13 }
  0xfb   :  { %358 = shalt.err (!%p355_p1)
}
  0xfc   :  { %293 = dma.vmem_to_hbm [thread:$0]  %s291_s1, 256, %s431_s3, [#allocation4]  }
  0xfd   :  { %361 = dma.done.wait [#allocation4], 256  }
  0xfe   :  { %362 = vsyncadd [#allocation4], 4294967040 }
  0xff   :  { %297 = vsyncpa [#allocation3], 1 }
 0x100   :  { %298 = vsyncpa [#allocation4], 1 }

</bundles_post_ra>
